<compile_context>
chip_gen: v7x
topology: tpu7x:2x2x1
jax: 0.10.0
libtpu: 0.0.40
codegen_flags: <defaults>
</compile_context>

<pallas_src>
import jax
import jax.numpy as jnp
from jax.experimental import pallas as pl
from jax.experimental.pallas import tpu as pltpu

IN_FEATURES = 28 * 28     # 784 (multiple of 8 -> sublane aligned, no K pad)
HIDDEN = 128
OUT = 10
OUT_PAD = 128             # lane-dense fc2 output; wrapper slices [:, :10]


def _round_up(n, m):
    return ((n + m - 1) // m) * m


def mlp_kernel(x_ref, w1_ref, b1_ref, w2_ref, b2_ref, o_ref):
    # fc1: (TB, 784)f32 -> bf16 @ (784, 128)bf16, f32 accumulation.
    x = x_ref[...].astype(jnp.bfloat16)
    w1 = w1_ref[...].astype(jnp.bfloat16)
    h = jnp.dot(x, w1, preferred_element_type=jnp.float32)
    h = jnp.maximum(h + b1_ref[...], 0.0)          # f32 epilogue (v5e-safe)
    # fc2: (TB, 128)bf16 @ (128, 128)bf16, lane-dense padded output.
    y = jnp.dot(h.astype(jnp.bfloat16), w2_ref[...].astype(jnp.bfloat16),
                preferred_element_type=jnp.float32)
    o_ref[...] = (y + b2_ref[...]).astype(o_ref.dtype)   # bf16 writeback


def simple_nn_forward(x, w1, b1, w2, b2, *, tb=2048):
    """x: any shape flattening to (-1, 784). w1: (784,128), b1: (128,),
    w2: (128,10), b2: (10,). Returns (B, 10) float32 logits."""
    x2d = x.reshape(-1, IN_FEATURES).astype(jnp.float32)
    B = x2d.shape[0]

    # Only tiny constant-size pads remain (w2 / b2 to 128 lanes, ~70 KB).
    w2p = jnp.pad(w2.astype(jnp.float32), ((0, 0), (0, OUT_PAD - OUT)))
    b1_2d = b1.reshape(1, HIDDEN).astype(jnp.float32)
    b2_2d = jnp.pad(b2.reshape(1, OUT).astype(jnp.float32),
                    ((0, 0), (0, OUT_PAD - OUT)))

    # Batch tile: multiple of 16 (bf16 output sublane packing).  For batches
    # that span more than one tile, aim for >= 2 grid steps so v7x megacore
    # has work for both TensorCores; the last tile may be partial.
    if B <= 16:
        TB = 16
    else:
        TB = max(16, min(tb, _round_up(pl.cdiv(B, 2), 16)))
    grid = (pl.cdiv(B, TB),)

    cost = pl.CostEstimate(
        flops=2 * B * (IN_FEATURES * HIDDEN + HIDDEN * OUT_PAD),
        transcendentals=0,
        bytes_accessed=(B * IN_FEATURES * 4          # x read (f32)
                        + B * OUT_PAD * 2            # out write (bf16)
                        + IN_FEATURES * HIDDEN * 4   # w1
                        + HIDDEN * OUT_PAD * 4       # w2 (padded)
                        + HIDDEN * 4 + OUT_PAD * 4), # biases
    )

    out = pl.pallas_call(
        mlp_kernel,
        out_shape=jax.ShapeDtypeStruct((B, OUT_PAD), jnp.bfloat16),
        grid=grid,
        in_specs=[
            pl.BlockSpec((TB, IN_FEATURES), lambda i: (i, 0)),      # x streamed
            pl.BlockSpec((IN_FEATURES, HIDDEN), lambda i: (0, 0)),  # w1 resident
            pl.BlockSpec((1, HIDDEN), lambda i: (0, 0)),            # b1 resident
            pl.BlockSpec((HIDDEN, OUT_PAD), lambda i: (0, 0)),      # w2 resident
            pl.BlockSpec((1, OUT_PAD), lambda i: (0, 0)),           # b2 resident
        ],
        out_specs=pl.BlockSpec((TB, OUT_PAD), lambda i: (i, 0)),
        compiler_params=pltpu.CompilerParams(
            dimension_semantics=("parallel",),   # megacore sharding on v7x
            vmem_limit_bytes=32 << 20,           # explicit (v5e default is 16 MiB)
        ),
        cost_estimate=cost,
    )(x2d, w1.astype(jnp.float32), b1_2d, w2p, b2_2d)

    # Single tiny fused slice+cast back to f32 logits.
    return out[:, :OUT].astype(jnp.float32)


def init_params(key):
    """Deterministic init mimicking torch.nn.Linear defaults; weights stored
    as (in, out) == transpose of torch's (out, in)."""
    k1, k2, k3, k4 = jax.random.split(key, 4)
    bound1 = 1.0 / jnp.sqrt(jnp.float32(IN_FEATURES))
    bound2 = 1.0 / jnp.sqrt(jnp.float32(HIDDEN))
    w1 = jax.random.uniform(k1, (IN_FEATURES, HIDDEN), jnp.float32, -bound1, bound1)
    b1 = jax.random.uniform(k2, (HIDDEN,), jnp.float32, -bound1, bound1)
    w2 = jax.random.uniform(k3, (HIDDEN, OUT), jnp.float32, -bound2, bound2)
    b2 = jax.random.uniform(k4, (OUT,), jnp.float32, -bound2, bound2)
    return w1, b1, w2, b2


if __name__ == "__main__":
    key = jax.random.PRNGKey(0)
    pkey, xkey = jax.random.split(key)
    w1, b1, w2, b2 = init_params(pkey)

    B = 8
    x = jax.random.normal(xkey, (B, 1, 28, 28), jnp.float32)  # NCHW, like MNIST

    out = simple_nn_forward(x, w1, b1, w2, b2)
    out = jax.block_until_ready(out)
    assert out.shape == (B, OUT)

    x2d = x.reshape(-1, IN_FEATURES)

    # bf16-emulated reference (matches kernel math: bf16 operands, f32 acc,
    # bf16 output round).
    xb = x2d.astype(jnp.bfloat16).astype(jnp.float32)
    w1b = w1.astype(jnp.bfloat16).astype(jnp.float32)
    w2b = w2.astype(jnp.bfloat16).astype(jnp.float32)
    hb = jnp.maximum(xb @ w1b + b1, 0.0)
    ref = hb.astype(jnp.bfloat16).astype(jnp.float32) @ w2b + b2
    ref_bf16 = ref.astype(jnp.bfloat16).astype(jnp.float32)
    assert jnp.allclose(out, ref_bf16, atol=2e-2, rtol=2e-2)

    # loose sanity check against pure-f32 reference (bf16 streams lose ~3
    # decimal digits, so tolerance is deliberately relaxed)
    ref_f32 = jnp.maximum(x2d @ w1 + b1, 0.0) @ w2 + b2
    assert jnp.allclose(out, ref_f32, atol=5e-2, rtol=5e-2)

    print("KERNEL_OK")
</pallas_src>

<mosaic_0001>
module attributes {stable_mosaic.version = 11 : i64} {
  func.func @mlp_kernel(%arg0: i32, %arg1: memref<16x784xf32, #tpu.memory_space<vmem>>, %arg2: memref<784x128xf32, #tpu.memory_space<vmem>>, %arg3: memref<1x128xf32, #tpu.memory_space<vmem>>, %arg4: memref<128x128xf32, #tpu.memory_space<vmem>>, %arg5: memref<1x128xf32, #tpu.memory_space<vmem>>, %arg6: memref<16x128xbf16, #tpu.memory_space<vmem>>) attributes {dimension_semantics = [#tpu.dimension_semantics<parallel>], iteration_bounds = array<i64: 1>, scalar_prefetch = 0 : i64, scratch_operands = 0 : i64, tpu.core_type = #tpu.core_type<tc>, window_params = [{transform_indices = @transform_0, window_bounds = array<i64: 16, 784>}, {pipeline_mode = #tpu.pipeline_mode<synchronous>, transform_indices = @transform_1, window_bounds = array<i64: 784, 128>}, {pipeline_mode = #tpu.pipeline_mode<synchronous>, transform_indices = @transform_2, window_bounds = array<i64: 1, 128>}, {pipeline_mode = #tpu.pipeline_mode<synchronous>, transform_indices = @transform_3, window_bounds = array<i64: 128, 128>}, {pipeline_mode = #tpu.pipeline_mode<synchronous>, transform_indices = @transform_4, window_bounds = array<i64: 1, 128>}, {transform_indices = @transform_5, window_bounds = array<i64: 16, 128>}]} {
    %c0 = arith.constant 0 : index
    %c0_0 = arith.constant 0 : index
    %0 = vector.load %arg1[%c0, %c0_0] : memref<16x784xf32, #tpu.memory_space<vmem>>, vector<16x784xf32>
    %1 = arith.truncf %0 : vector<16x784xf32> to vector<16x784xbf16>
    %c0_1 = arith.constant 0 : index
    %c0_2 = arith.constant 0 : index
    %2 = vector.load %arg2[%c0_1, %c0_2] : memref<784x128xf32, #tpu.memory_space<vmem>>, vector<784x128xf32>
    %3 = arith.truncf %2 : vector<784x128xf32> to vector<784x128xbf16>
    %cst = arith.constant dense<0.000000e+00> : vector<16x128xf32>
    %4 = tpu.matmul %1, %3, %cst {dimension_numbers = #tpu.dot_dimension_numbers<[1], [0], [0], [1], [0, 0, 1, 1], [], []>} : vector<16x784xbf16>, vector<784x128xbf16>, vector<16x128xf32> -> vector<16x128xf32>
    %c0_3 = arith.constant 0 : index
    %c0_4 = arith.constant 0 : index
    %5 = vector.load %arg3[%c0_3, %c0_4] : memref<1x128xf32, #tpu.memory_space<vmem>>, vector<1x128xf32>
    %6 = vector.broadcast %5 : vector<1x128xf32> to vector<16x128xf32>
    %7 = arith.addf %4, %6 : vector<16x128xf32>
    %cst_5 = arith.constant 0.000000e+00 : f32
    %8 = vector.broadcast %cst_5 : f32 to vector<16x128xf32>
    %9 = arith.maximumf %7, %8 : vector<16x128xf32>
    %10 = arith.truncf %9 : vector<16x128xf32> to vector<16x128xbf16>
    %c0_6 = arith.constant 0 : index
    %c0_7 = arith.constant 0 : index
    %11 = vector.load %arg4[%c0_6, %c0_7] : memref<128x128xf32, #tpu.memory_space<vmem>>, vector<128x128xf32>
    %12 = arith.truncf %11 : vector<128x128xf32> to vector<128x128xbf16>
    %cst_8 = arith.constant dense<0.000000e+00> : vector<16x128xf32>
    %13 = tpu.matmul %10, %12, %cst_8 {dimension_numbers = #tpu.dot_dimension_numbers<[1], [0], [0], [1], [0, 0, 1, 1], [], []>} : vector<16x128xbf16>, vector<128x128xbf16>, vector<16x128xf32> -> vector<16x128xf32>
    %c0_9 = arith.constant 0 : index
    %c0_10 = arith.constant 0 : index
    %14 = vector.load %arg5[%c0_9, %c0_10] : memref<1x128xf32, #tpu.memory_space<vmem>>, vector<1x128xf32>
    %15 = vector.broadcast %14 : vector<1x128xf32> to vector<16x128xf32>
    %16 = arith.addf %13, %15 : vector<16x128xf32>
    %17 = arith.truncf %16 : vector<16x128xf32> to vector<16x128xbf16>
    %c0_11 = arith.constant 0 : index
    %c0_12 = arith.constant 0 : index
    %18 = vector.load %arg6[%c0_11, %c0_12] : memref<16x128xbf16, #tpu.memory_space<vmem>>, vector<16x128xbf16>
    tpu.vector_store %arg6[%c0_11, %c0_12], %17 {strides = array<i32>} : memref<16x128xbf16, #tpu.memory_space<vmem>>, vector<16x128xbf16>,
    return
  }
  func.func @transform_0(%arg0: i32) -> (i32, i32) {
    %c0_i32 = arith.constant 0 : i32
    %c0_i32_0 = arith.constant 0 : i32
    return %arg0, %c0_i32 : i32, i32
  }
  func.func @transform_1(%arg0: i32) -> (i32, i32) {
    %c0_i32 = arith.constant 0 : i32
    %c0_i32_0 = arith.constant 0 : i32
    %c0_i32_1 = arith.constant 0 : i32
    return %c0_i32, %c0_i32_0 : i32, i32
  }
  func.func @transform_2(%arg0: i32) -> (i32, i32) {
    %c0_i32 = arith.constant 0 : i32
    %c0_i32_0 = arith.constant 0 : i32
    %c0_i32_1 = arith.constant 0 : i32
    return %c0_i32, %c0_i32_0 : i32, i32
  }
  func.func @transform_3(%arg0: i32) -> (i32, i32) {
    %c0_i32 = arith.constant 0 : i32
    %c0_i32_0 = arith.constant 0 : i32
    %c0_i32_1 = arith.constant 0 : i32
    return %c0_i32, %c0_i32_0 : i32, i32
  }
  func.func @transform_4(%arg0: i32) -> (i32, i32) {
    %c0_i32 = arith.constant 0 : i32
    %c0_i32_0 = arith.constant 0 : i32
    %c0_i32_1 = arith.constant 0 : i32
    return %c0_i32, %c0_i32_0 : i32, i32
  }
  func.func @transform_5(%arg0: i32) -> (i32, i32) {
    %c0_i32 = arith.constant 0 : i32
    %c0_i32_0 = arith.constant 0 : i32
    return %arg0, %c0_i32 : i32, i32
  }
}

</mosaic_0001>

<bundles_post_ra>
// kernel: tpu_custom_call.1
= control target key start
LH: loop header
LB: loop body
LE: loop exit
PB: predicated region body
PF: predicated region fallthrough
CT: control target
= control target key end

     0   :  { %10 = vsyncpa [#allocation3], 0  ;;  %s845_s0 = inlined_call_operand.hbm [shape: f32[8,784], index: 0, kind: input, shape index: {}]   ;;  %s846_s1 = inlined_call_operand.hbm [shape: f32[784,128], index: 1, kind: input, shape index: {}]   ;;  %s847_s2 = inlined_call_operand.vmem [shape: f32[1,128], index: 2, kind: input, shape index: {}]   ;;  %s848_s3 = inlined_call_operand.hbm [shape: f32[128,128], index: 3, kind: input, shape index: {}]   ;;  %s849_s4 = inlined_call_operand.vmem [shape: f32[1,128], index: 4, kind: input, shape index: {}]   ;;  %s850_s5 = inlined_call_operand.hbm [shape: bf16[8,128], index: 5, kind: output, shape index: {}]  }
   0x1   :  { %11 = vsyncpa [#allocation6], 0 }
   0x2   :  { %12 = vsyncpa [#allocation4], 0 }
   0x3   :  { %17 = vsyncadd [#allocation3], 896  ;;  %s730_s18 = smov [#allocation5]   ;;  %s636_s22 = scalar_lea.hbm %s846_s1, 12544 }
   0x4   :  { %s30_s19 = sshll.u32 %s730_s18, 4  ;;  %p637_p0 = scmp.ne.s32.totalorder %s846_s1, %s636_s22  ;;  %s31_s19 = int_to_ptr.vmem [resolvable:$true] %s30_s19 }
   0x5   :  { %p640_p1 = scmp.lt.u32.totalorder %s636_s22, %s846_s1 }
   0x7   :  { %p642_p2 = pnand %p640_p1, %p637_p0 }
   0x9   :  { %645 = shalt.err (!%p642_p2)
}
   0xa   :  { %s646_s27 = scalar_lea.vmem %s31_s19, 12544  ;;  %p651_p4 = scmp.lt.s32.totalorder %s31_s19, %s31_s19 }
   0xb   :  { %p647_p3 = scmp.ne.s32.totalorder %s31_s19, %s646_s27  ;;  %p652_p5 = scmp.lt.s32.totalorder %s646_s27, %s646_s27 }
   0xd   :  { %p653_p6 = por %p652_p5, %p651_p4 }
   0xf   :  { %p654_p7 = pnand %p653_p6, %p647_p3 }
  0x11   :  { %657 = shalt.err (!%p654_p7)
}
  0x12   :  { %s731_s28 = smov 128   ;;  %s732_s29 = smov 8  }
  0x13   :  { %36 = dma.hbm_to_vmem [thread:$0]  %s846_s1, 12544, %s31_s19, [#allocation6], %s731_s28, %s731_s28, %s732_s29  }
  0x14   :  { %s733_s7 = smov [#allocation2]   ;;  %s658_s11 = scalar_lea.hbm %s845_s0, 896 }
  0x15   :  { %s18_s8 = sshll.u32 %s733_s7, 4  ;;  %p659_p8 = scmp.ne.s32.totalorder %s845_s0, %s658_s11  ;;  %s19_s8 = int_to_ptr.vmem [resolvable:$true] %s18_s8 }
  0x16   :  { %p662_p9 = scmp.lt.u32.totalorder %s658_s11, %s845_s0 }
  0x18   :  { %p664_p10 = pnand %p662_p9, %p659_p8 }
  0x1a   :  { %667 = shalt.err (!%p664_p10)
}
  0x1b   :  { %s668_s16 = scalar_lea.vmem %s19_s8, 896  ;;  %s672_s1 = scalar_lea.vmem %s19_s8, 1792 }
  0x1c   :  { %p669_p11 = scmp.ne.s32.totalorder %s19_s8, %s668_s16  ;;  %p673_p12 = scmp.lt.s32.totalorder %s19_s8, %s19_s8 }
  0x1d   :  { %p674_p13 = scmp.lt.s32.totalorder %s672_s1, %s668_s16 }
  0x1f   :  { %p675_p0 = por %p674_p13, %p673_p12 }
  0x21   :  { %p676_p1 = pnand %p675_p0, %p669_p11 }
  0x23   :  { %679 = shalt.err (!%p676_p1)
}
  0x24   :  { %s734_s17 = smov 896   ;;  %s735_s18 = smov 56  }
  0x25   :  { %24 = dma.hbm_to_vmem [thread:$0]  %s845_s0, 896, %s19_s8, [#allocation3], %s734_s17, %s734_s17, %s735_s18  }
  0x26   :  { %s736_s21 = smov [#allocation7]   ;;  %s680_s25 = scalar_lea.hbm %s848_s3, 2048 }
  0x27   :  { %s44_s22 = sshll.u32 %s736_s21, 4  ;;  %p681_p2 = scmp.ne.s32.totalorder %s848_s3, %s680_s25  ;;  %s45_s22 = int_to_ptr.vmem [resolvable:$true] %s44_s22 }
  0x28   :  { %p684_p3 = scmp.lt.u32.totalorder %s680_s25, %s848_s3 }
  0x2a   :  { %p686_p4 = pnand %p684_p3, %p681_p2 }
  0x2c   :  { %689 = shalt.err (!%p686_p4)
}
  0x2d   :  { %s690_s7 = scalar_lea.vmem %s45_s22, 2048  ;;  %p695_p6 = scmp.lt.s32.totalorder %s45_s22, %s45_s22 }
  0x2e   :  { %p691_p5 = scmp.ne.s32.totalorder %s45_s22, %s690_s7  ;;  %p696_p7 = scmp.lt.s32.totalorder %s690_s7, %s690_s7 }
  0x30   :  { %p697_p8 = por %p696_p7, %p695_p6 }
  0x32   :  { %p698_p9 = pnand %p697_p8, %p691_p5 }
  0x34   :  { %701 = shalt.err (!%p698_p9)
}
  0x35   :  { %50 = dma.hbm_to_vmem [thread:$0]  %s848_s3, 2048, %s45_s22, [#allocation6], %s731_s28, %s731_s28, %s732_s29  }
  0x36   :  { %724 = dma.done.wait [#allocation3], 1792  }
  0x37   :  { %725 = vsyncadd [#allocation3], 4294965504 }
  0x38   :  { %726 = dma.done.wait [#allocation6], 14592  }
  0x39   :  { %727 = vsyncadd [#allocation6], 4294952704  ;;  %v100_v0 = vld [vmem:[#allocation5 + $0x80] sm:$0xff]  ;;  %v101_v1 = vld [vmem:[#allocation5 + $0x88] sm:$0xff]  ;;  %vm738_vm0 = vmmov 0   ;;  %vm238_vm1 = vcmask 130048  }
  0x3a   :  { %v84_v2 = vld [vmem:[#allocation5] sm:$0xff]  ;;  %v190_v3 = vpack.c.bf16 %v101_v1, %v100_v0  ;;  %v85_v4 = vld [vmem:[#allocation5 + $0x8] sm:$0xff]  ;;  %v102_v11 = vld [vmem:[#allocation5 + $0x90] sm:$0xff] }
  0x3b   :  { %v132_v5 = vld [vmem:[#allocation5 + $0x180] sm:$0xff]  ;;  %v133_v6 = vld [vmem:[#allocation5 + $0x188] sm:$0xff]  ;;  %v182_v7 = vpack.c.bf16 %v85_v4, %v84_v2  ;;  %v103_v13 = vld [vmem:[#allocation5 + $0x98] sm:$0xff] }
  0x3c   :  { %v206_v8 = vpack.c.bf16 %v133_v6, %v132_v5  ;;  %v116_v9 = vld [vmem:[#allocation5 + $0x100] sm:$0xff]  ;;  %v117_v10 = vld [vmem:[#allocation5 + $0x108] sm:$0xff]  ;;  %521 = vmatprep.subr.bf16.mxu0 %v190_v3  ;;  %v86_v14 = vld [vmem:[#allocation5 + $0x10] sm:$0xff]  ;;  %v191_v16 = vpack.c.bf16 %v103_v13, %v102_v11 }
  0x3d   :  { %v198_v12 = vpack.c.bf16 %v117_v10, %v116_v9  ;;  %v87_v15 = vld [vmem:[#allocation5 + $0x18] sm:$0xff]  ;;  %522 = vmatpush3.bf16.msra.mxu0 %v182_v7  ;;  %v134_v18 = vld [vmem:[#allocation5 + $0x190] sm:$0xff]  ;;  %v104_v23 = vld [vmem:[#allocation5 + $0xa0] sm:$0xff] }
  0x3e   :  { %543 = vmatprep.subr.bf16.mxu1 %v206_v8  ;;  %v183_v17 = vpack.c.bf16 %v87_v15, %v86_v14  ;;  %v135_v19 = vld [vmem:[#allocation5 + $0x198] sm:$0xff]  ;;  %v118_v20 = vld [vmem:[#allocation5 + $0x110] sm:$0xff]  ;;  %v105_v24 = vld [vmem:[#allocation5 + $0xa8] sm:$0xff]  ;;  %523 = vmatprep.subr.bf16.mxu0 %v191_v16 }
  0x3f   :  { %544 = vmatpush3.bf16.msra.mxu1 %v198_v12  ;;  %v207_v21 = vpack.c.bf16 %v135_v19, %v134_v18  ;;  %v119_v22 = vld [vmem:[#allocation5 + $0x118] sm:$0xff]  ;;  %v192_v26 = vpack.c.bf16 %v105_v24, %v104_v23  ;;  %v88_v27 = vld [vmem:[#allocation5 + $0x20] sm:$0xff]  ;;  %v89_v28 = vld [vmem:[#allocation5 + $0x28] sm:$0xff] }
  0x40   :  { %v199_v25 = vpack.c.bf16 %v119_v22, %v118_v20  ;;  %v136_v29 = vld [vmem:[#allocation5 + $0x1a0] sm:$0xff]  ;;  %v137_v30 = vld [vmem:[#allocation5 + $0x1a8] sm:$0xff]  ;;  %v184_v33 = vpack.c.bf16 %v89_v28, %v88_v27  ;;  %v106_v35 = vld [vmem:[#allocation5 + $0xb0] sm:$0xff] }
  0x41   :  { %545 = vmatprep.subr.bf16.mxu1 %v207_v21  ;;  %v120_v31 = vld [vmem:[#allocation5 + $0x120] sm:$0xff]  ;;  %v121_v32 = vld [vmem:[#allocation5 + $0x128] sm:$0xff]  ;;  %524 = vmatpush3.bf16.msra.mxu0 %v183_v17  ;;  %v208_v34 = vpack.c.bf16 %v137_v30, %v136_v29  ;;  %v107_v36 = vld [vmem:[#allocation5 + $0xb8] sm:$0xff] }
  0x42   :  { %v90_v37 = vld [vmem:[#allocation5 + $0x30] sm:$0xff]  ;;  %525 = vmatprep.subr.bf16.mxu0 %v192_v26  ;;  %v200_v38 = vpack.c.bf16 %v121_v32, %v120_v31  ;;  %v193_v39 = vpack.c.bf16 %v107_v36, %v106_v35  ;;  %v91_v40 = vld [vmem:[#allocation5 + $0x38] sm:$0xff]  ;;  %v108_v46 = vld [vmem:[#allocation5 + $0xc0] sm:$0xff] }
  0x43   :  { %546 = vmatpush3.bf16.msra.mxu1 %v199_v25  ;;  %v138_v41 = vld [vmem:[#allocation5 + $0x1b0] sm:$0xff]  ;;  %v139_v42 = vld [vmem:[#allocation5 + $0x1b8] sm:$0xff]  ;;  %v109_v47 = vld [vmem:[#allocation5 + $0xc8] sm:$0xff]  ;;  %v185_v48 = vpack.c.bf16 %v91_v40, %v90_v37 }
  0x44   :  { %547 = vmatprep.subr.bf16.mxu1 %v208_v34  ;;  %v209_v43 = vpack.c.bf16 %v139_v42, %v138_v41  ;;  %v122_v44 = vld [vmem:[#allocation5 + $0x130] sm:$0xff]  ;;  %v123_v45 = vld [vmem:[#allocation5 + $0x138] sm:$0xff]  ;;  %v140_v49 = vld [vmem:[#allocation5 + $0x1c0] sm:$0xff]  ;;  %v194_v52 = vpack.c.bf16 %v109_v47, %v108_v46 }
  0x45   :  { %526 = vmatpush3.bf16.msra.mxu0 %v184_v33  ;;  %v141_v50 = vld [vmem:[#allocation5 + $0x1c8] sm:$0xff]  ;;  %v201_v51 = vpack.c.bf16 %v123_v45, %v122_v44  ;;  %v92_v53 = vld [vmem:[#allocation5 + $0x40] sm:$0xff]  ;;  %v110_v58 = vld [vmem:[#allocation5 + $0xd0] sm:$0xff] }
  0x46   :  { %527 = vmatprep.subr.bf16.mxu0 %v193_v39  ;;  %v93_v54 = vld [vmem:[#allocation5 + $0x48] sm:$0xff]  ;;  %v124_v55 = vld [vmem:[#allocation5 + $0x140] sm:$0xff]  ;;  %v210_v56 = vpack.c.bf16 %v141_v50, %v140_v49  ;;  %v111_v59 = vld [vmem:[#allocation5 + $0xd8] sm:$0xff] }
  0x47   :  { %548 = vmatpush3.bf16.msra.mxu1 %v200_v38  ;;  %v125_v57 = vld [vmem:[#allocation5 + $0x148] sm:$0xff]  ;;  %v142_v60 = vld [vmem:[#allocation5 + $0x1d0] sm:$0xff]  ;;  %v143_v61 = vld [vmem:[#allocation5 + $0x1d8] sm:$0xff]  ;;  %v186_v62 = vpack.c.bf16 %v93_v54, %v92_v53  ;;  %v195_v0 = vpack.c.bf16 %v111_v59, %v110_v58 }
  0x48   :  { %549 = vmatprep.subr.bf16.mxu1 %v209_v43  ;;  %v202_v63 = vpack.c.bf16 %v125_v57, %v124_v55  ;;  %v94_v1 = vld [vmem:[#allocation5 + $0x50] sm:$0xff]  ;;  %v95_v2 = vld [vmem:[#allocation5 + $0x58] sm:$0xff]  ;;  %v211_v4 = vpack.c.bf16 %v143_v61, %v142_v60  ;;  %v112_v6 = vld [vmem:[#allocation5 + $0xe0] sm:$0xff]  ;;  %v737_v57 = vmov 0.0  }
  0x49   :  { %528 = vmatpush3.bf16.msra.mxu0 %v185_v48  ;;  %v126_v3 = vld [vmem:[#allocation5 + $0x150] sm:$0xff]  ;;  %v127_v5 = vld [vmem:[#allocation5 + $0x158] sm:$0xff]  ;;  %v113_v7 = vld [vmem:[#allocation5 + $0xe8] sm:$0xff]  ;;  %v187_v10 = vpack.c.bf16 %v95_v2, %v94_v1 }
  0x4a   :  { %529 = vmatprep.subr.bf16.mxu0 %v194_v52  ;;  %v144_v8 = vld [vmem:[#allocation5 + $0x1e0] sm:$0xff]  ;;  %v145_v9 = vld [vmem:[#allocation5 + $0x1e8] sm:$0xff]  ;;  %v64_v13 = vld [vmem:[#allocation2 + $0x8] sm:$0xff]  ;;  %v203_v14 = vpack.c.bf16 %v127_v5, %v126_v3  ;;  %v196_v15 = vpack.c.bf16 %v113_v7, %v112_v6 }
  0x4b   :  { %550 = vmatpush3.bf16.msra.mxu1 %v201_v51  ;;  %v96_v11 = vld [vmem:[#allocation5 + $0x60] sm:$0xff]  ;;  %v97_v12 = vld [vmem:[#allocation5 + $0x68] sm:$0xff]  ;;  %v71_v18 = vld [vmem:[#allocation2 + $0x40] sm:$0xff]  ;;  %v212_v19 = vpack.c.bf16 %v145_v9, %v144_v8 }
  0x4c   :  { %551 = vmatprep.subr.bf16.mxu1 %v210_v56  ;;  %v128_v16 = vld [vmem:[#allocation5 + $0x160] sm:$0xff]  ;;  %v129_v17 = vld [vmem:[#allocation5 + $0x168] sm:$0xff]  ;;  %v114_v20 = vld [vmem:[#allocation5 + $0xf0] sm:$0xff]  ;;  %v78_v23 = vpack.c.bf16 %v71_v18, %v64_v13  ;;  %v188_v27 = vpack.c.bf16 %v97_v12, %v96_v11 }
  0x4d   :  { %530 = vmatpush3.bf16.msra.mxu0 %v186_v62  ;;  %v115_v21 = vld [vmem:[#allocation5 + $0xf8] sm:$0xff]  ;;  %v146_v22 = vld [vmem:[#allocation5 + $0x1f0] sm:$0xff]  ;;  %v66_v25 = vld [vmem:[#allocation2 + $0x18] sm:$0xff]  ;;  %v204_v29 = vpack.c.bf16 %v129_v17, %v128_v16 }
  0x4e   :  { %531 = vmatprep.subr.bf16.mxu0 %v195_v0  ;;  %v147_v24 = vld [vmem:[#allocation5 + $0x1f8] sm:$0xff]  ;;  %v73_v26 = vld [vmem:[#allocation2 + $0x50] sm:$0xff]  ;;  %274 = vmatprep.mubr.bf16.mxu0 %v78_v23  ;;  %v197_v30 = vpack.c.bf16 %v115_v21, %v114_v20  ;;  %v98_v31 = vld [vmem:[#allocation5 + $0x70] sm:$0xff] }
  0x4f   :  { %552 = vmatpush3.bf16.msra.mxu1 %v202_v63  ;;  %v80_v28 = vpack.c.bf16 %v73_v26, %v66_v25  ;;  %v99_v32 = vld [vmem:[#allocation5 + $0x78] sm:$0xff]  ;;  %v130_v33 = vld [vmem:[#allocation5 + $0x170] sm:$0xff]  ;;  %v213_v34 = vpack.c.bf16 %v147_v24, %v146_v22  ;;  %v164_v36 = vld [vmem:[#allocation5 + $0x280] sm:$0xff] }
  0x50   :  { %553 = vmatprep.subr.bf16.mxu1 %v211_v4  ;;  %v131_v35 = vld [vmem:[#allocation5 + $0x178] sm:$0xff]  ;;  %v165_v37 = vld [vmem:[#allocation5 + $0x288] sm:$0xff]  ;;  %v189_v38 = vpack.c.bf16 %v99_v32, %v98_v31  ;;  %v63_v39 = vld [vmem:[#allocation2] sm:$0xff] }
  0x51   :  { %532 = vmatpush3.bf16.msra.mxu0 %v187_v10  ;;  %315 = vmatprep.mubr.bf16.mxu1 %v80_v28  ;;  %v70_v40 = vld [vmem:[#allocation2 + $0x38] sm:$0xff]  ;;  %v148_v41 = vld [vmem:[#allocation5 + $0x200] sm:$0xff]  ;;  %v205_v42 = vpack.c.bf16 %v131_v35, %v130_v33  ;;  %v222_v43 = vpack.c.bf16 %v165_v37, %v164_v36  ;;  %v72_v46 = vld [vmem:[#allocation2 + $0x48] sm:$0xff] }
  0x52   :  { %533 = vmatprep.subr.bf16.mxu0 %v196_v15  ;;  %v149_v44 = vld [vmem:[#allocation5 + $0x208] sm:$0xff]  ;;  %v65_v45 = vld [vmem:[#allocation2 + $0x10] sm:$0xff]  ;;  %v166_v47 = vld [vmem:[#allocation5 + $0x290] sm:$0xff]  ;;  %v77_v49 = vpack.c.bf16 %v70_v40, %v63_v39 }
  0x53   :  { %554 = vmatpush3.bf16.msra.mxu1 %v203_v14  ;;  %v167_v48 = vld [vmem:[#allocation5 + $0x298] sm:$0xff]  ;;  %v214_v50 = vpack.c.bf16 %v149_v44, %v148_v41  ;;  %v79_v51 = vpack.c.bf16 %v72_v46, %v65_v45  ;;  %v150_v53 = vld [vmem:[#allocation5 + $0x210] sm:$0xff]  ;;  %v168_v55 = vld [vmem:[#allocation5 + $0x2a0] sm:$0xff] }
  0x54   :  { %555 = vmatprep.subr.bf16.mxu1 %v212_v19  ;;  %v223_v52 = vpack.c.bf16 %v167_v48, %v166_v47  ;;  %v151_v54 = vld [vmem:[#allocation5 + $0x218] sm:$0xff]  ;;  %v169_v56 = vld [vmem:[#allocation5 + $0x2a8] sm:$0xff]  ;;  %v180_v58 = vld [vmem:[#allocation5 + $0x300] sm:$0xff] }
  0x55   :  { %534 = vmatpush3.bf16.msra.mxu0 %v188_v27  ;;  %v181_v59 = vld [vmem:[#allocation5 + $0x308] sm:$0xff]  ;;  %v68_v60 = vld [vmem:[#allocation2 + $0x28] sm:$0xff]  ;;  %v75_v61 = vld [vmem:[#allocation2 + $0x60] sm:$0xff]  ;;  %v215_v62 = vpack.c.bf16 %v151_v54, %v150_v53  ;;  %v224_v2 = vpack.c.bf16 %v169_v56, %v168_v55 }
  0x56   :  { %535 = vmatprep.subr.bf16.mxu0 %v197_v30  ;;  %v152_v63 = vld [vmem:[#allocation5 + $0x220] sm:$0xff]  ;;  %v230_v0 = vpack.c.bf16 %v181_v59, %v180_v58  ;;  %v82_v1 = vpack.c.bf16 %v75_v61, %v68_v60  ;;  %v153_v3 = vld [vmem:[#allocation5 + $0x228] sm:$0xff]  ;;  %v76_v5 = vld [vmem:[#allocation2 + $0x68] sm:$0xff] }
  0x57   :  { %556 = vmatpush3.bf16.msra.mxu1 %v204_v29  ;;  %v69_v4 = vld [vmem:[#allocation2 + $0x30] sm:$0xff]  ;;  %v170_v6 = vld [vmem:[#allocation5 + $0x2b0] sm:$0xff]  ;;  %v171_v7 = vld [vmem:[#allocation5 + $0x2b8] sm:$0xff]  ;;  %v216_v8 = vpack.c.bf16 %v153_v3, %v152_v63 }
  0x58   :  { %557 = vmatprep.subr.bf16.mxu1 %v213_v34  ;;  %v83_v9 = vpack.c.bf16 %v76_v5, %v69_v4  ;;  %v225_v10 = vpack.c.bf16 %v171_v7, %v170_v6  ;;  %v154_v11 = vld [vmem:[#allocation5 + $0x230] sm:$0xff]  ;;  %v155_v12 = vld [vmem:[#allocation5 + $0x238] sm:$0xff]  ;;  %v172_v13 = vld [vmem:[#allocation5 + $0x2c0] sm:$0xff] }
  0x59   :  { %536 = vmatpush3.bf16.msra.mxu0 %v189_v38  ;;  %v173_v14 = vld [vmem:[#allocation5 + $0x2c8] sm:$0xff]  ;;  %v217_v15 = vpack.c.bf16 %v155_v12, %v154_v11  ;;  %v156_v17 = vld [vmem:[#allocation5 + $0x240] sm:$0xff]  ;;  %v174_v19 = vld [vmem:[#allocation5 + $0x2d0] sm:$0xff] }
  0x5a   :  { %565 = vmatprep.subr.bf16.mxu0 %v222_v43  ;;  %v226_v16 = vpack.c.bf16 %v173_v14, %v172_v13  ;;  %v157_v18 = vld [vmem:[#allocation5 + $0x248] sm:$0xff]  ;;  %v175_v20 = vld [vmem:[#allocation5 + $0x2d8] sm:$0xff]  ;;  %v158_v23 = vld [vmem:[#allocation5 + $0x250] sm:$0xff] }
  0x5b   :  { %558 = vmatpush3.bf16.msra.mxu1 %v205_v42  ;;  %v218_v21 = vpack.c.bf16 %v157_v18, %v156_v17  ;;  %v227_v22 = vpack.c.bf16 %v175_v20, %v174_v19  ;;  %v159_v24 = vld [vmem:[#allocation5 + $0x258] sm:$0xff]  ;;  %v176_v25 = vld [vmem:[#allocation5 + $0x2e0] sm:$0xff]  ;;  %v177_v26 = vld [vmem:[#allocation5 + $0x2e8] sm:$0xff] }
  0x5c   :  { %598 = vmatprep.subr.bf16.mxu1 %v737_v57  ;;  %275 = vmatmul.mubr.bf16.vlgmr.msra.gmra.mrb[0].mxu0 %v77_v49  ;;  %v219_v27 = vpack.c.bf16 %v159_v24, %v158_v23  ;;  %v228_v28 = vpack.c.bf16 %v177_v26, %v176_v25  ;;  %v160_v29 = vld [vmem:[#allocation5 + $0x260] sm:$0xff]  ;;  %v161_v30 = vld [vmem:[#allocation5 + $0x268] sm:$0xff]  ;;  %v178_v31 = vld [vmem:[#allocation5 + $0x2f0] sm:$0xff] }
  0x5d   :  { %566 = vmatpush3.bf16.msra.mxu0 %v214_v50  ;;  %356 = vmatprep.mubr.bf16.mxu0 %v82_v1  ;;  %v179_v32 = vld [vmem:[#allocation5 + $0x2f8] sm:$0xff]  ;;  %v220_v33 = vpack.c.bf16 %v161_v30, %v160_v29  ;;  %v162_v35 = vld [vmem:[#allocation5 + $0x270] sm:$0xff]  ;;  %v74_v39 = vld [vmem:[#allocation2 + $0x58] sm:$0xff] }
  0x5e   :  { %316 = vmatmul.mubr.bf16.vlgmr.msra.gmra.mrb[0].mxu1 %v79_v51  ;;  %567 = vmatprep.subr.bf16.mxu0 %v223_v52  ;;  %v229_v34 = vpack.c.bf16 %v179_v32, %v178_v31  ;;  %v163_v36 = vld [vmem:[#allocation5 + $0x278] sm:$0xff]  ;;  %v67_v38 = vld [vmem:[#allocation2 + $0x20] sm:$0xff]  ;;  %v411_v43 = vld [vmem:[#allocation7 + $0x10] sm:$0xff] }
  0x5f   :  { %600 = vmatprep.mubr.msk.bf16.mxu1 %vm738_vm0, %v737_v57  ;;  %599 = vmatpush3.bf16.msra.mxu1 %v230_v0  ;;  %v221_v37 = vpack.c.bf16 %v163_v36, %v162_v35  ;;  %v81_v40 = vpack.c.bf16 %v74_v39, %v67_v38  ;;  %v409_v41 = vld [vmem:[#allocation7] sm:$0xff]  ;;  %v410_v42 = vld [vmem:[#allocation7 + $0x8] sm:$0xff]  ;;  %v412_v45 = vld [vmem:[#allocation7 + $0x18] sm:$0xff] }
  0x60   :  { %604 = vmatprep.subr.bf16.mxu1 %v737_v57  ;;  %v425_v44 = vpack.c.bf16 %v410_v42, %v409_v41  ;;  %v426_v46 = vpack.c.bf16 %v412_v45, %v411_v43  ;;  %v413_v47 = vld [vmem:[#allocation7 + $0x20] sm:$0xff]  ;;  %v414_v48 = vld [vmem:[#allocation7 + $0x28] sm:$0xff]  ;;  %v415_v50 = vld [vmem:[#allocation7 + $0x30] sm:$0xff] }
  0x61   :  { %568 = vmatpush3.bf16.msra.mxu0 %v215_v62  ;;  %v427_v49 = vpack.c.bf16 %v414_v48, %v413_v47  ;;  %v416_v51 = vld [vmem:[#allocation7 + $0x38] sm:$0xff]  ;;  %v417_v53 = vld [vmem:[#allocation7 + $0x40] sm:$0xff]  ;;  %v418_v54 = vld [vmem:[#allocation7 + $0x48] sm:$0xff] }
  0x62   :  { %569 = vmatprep.subr.bf16.mxu0 %v224_v2  ;;  %v428_v52 = vpack.c.bf16 %v416_v51, %v415_v50  ;;  %v429_v55 = vpack.c.bf16 %v418_v54, %v417_v53  ;;  %v419_v56 = vld [vmem:[#allocation7 + $0x50] sm:$0xff]  ;;  %v420_v58 = vld [vmem:[#allocation7 + $0x58] sm:$0xff]  ;;  %v421_v60 = vld [vmem:[#allocation7 + $0x60] sm:$0xff] }
  0x63   :  { %v430_v59 = vpack.c.bf16 %v420_v58, %v419_v56  ;;  %v422_v61 = vld [vmem:[#allocation7 + $0x68] sm:$0xff]  ;;  %v423_v63 = vld [vmem:[#allocation7 + $0x70] sm:$0xff]  ;;  %v424_v0 = vld [vmem:[#allocation7 + $0x78] sm:$0xff] }
  0x64   :  { %v431_v62 = vpack.c.bf16 %v422_v61, %v421_v60  ;;  %v432_v1 = vpack.c.bf16 %v424_v0, %v423_v63  ;;  %v509_v3 = vld [vmem:[%s847_s2] ss:$0 sm:$0xff] }
  0x65   :  { %570 = vmatpush3.bf16.msra.mxu0 %v216_v8  ;;  %v511_v35 = vld [vmem:[%s849_s4] ss:$0 sm:$0xff] }
  0x66   :  { %601 = vmatmul.mubr.msk.bf16.vlgmr.msra.gmra.mrb[4].mxu1 %vm238_vm1, %v83_v9  ;;  %571 = vmatprep.subr.bf16.mxu0 %v225_v10 }
  0x67   :  { %620 = vmatprep.mubr.msk.bf16.mxu1 %vm738_vm0, %v737_v57  ;;  %605 = vmatpush3.bf16.msra.mxu1 %v425_v44 }
  0x68   :  { %606 = vmatprep.subr.bf16.mxu1 %v737_v57 }
  0x69   :  { %572 = vmatpush3.bf16.msra.mxu0 %v217_v15 }
  0x6a   :  { %573 = vmatprep.subr.bf16.mxu0 %v226_v16 }
  0x6b   :  { %607 = vmatpush3.bf16.msra.mxu1 %v426_v46 }
  0x6c   :  { %608 = vmatprep.subr.bf16.mxu1 %v737_v57 }
  0x6d   :  { %574 = vmatpush3.bf16.msra.mxu0 %v218_v21 }
  0x6e   :  { %575 = vmatprep.subr.bf16.mxu0 %v227_v22 }
  0x6f   :  { %609 = vmatpush3.bf16.msra.mxu1 %v427_v49 }
  0x70   :  { %610 = vmatprep.subr.bf16.mxu1 %v737_v57 }
  0x71   :  { %576 = vmatpush3.bf16.msra.mxu0 %v219_v27 }
  0x72   :  { %577 = vmatprep.subr.bf16.mxu0 %v228_v28 }
  0x73   :  { %611 = vmatpush3.bf16.msra.mxu1 %v428_v52 }
  0x74   :  { %612 = vmatprep.subr.bf16.mxu1 %v737_v57 }
  0x75   :  { %578 = vmatpush3.bf16.msra.mxu0 %v220_v33 }
  0x76   :  { %579 = vmatprep.subr.bf16.mxu0 %v229_v34 }
  0x77   :  { %613 = vmatpush3.bf16.msra.mxu1 %v429_v55 }
  0x78   :  { %614 = vmatprep.subr.bf16.mxu1 %v737_v57 }
  0x79   :  { %580 = vmatpush3.bf16.msra.mxu0 %v221_v37 }
  0x7b   :  { %615 = vmatpush3.bf16.msra.mxu1 %v430_v59 }
  0x7c   :  { %357 = vmatmul.mubr.bf16.vlgmr.msra.gmra.mrb[4].mxu0 %v81_v40  ;;  %616 = vmatprep.subr.bf16.mxu1 %v737_v57 }
  0x7f   :  { %617 = vmatpush3.bf16.msra.mxu1 %v431_v62 }
  0x80   :  { %618 = vmatprep.subr.bf16.mxu1 %v737_v57 }
  0x83   :  { %619 = vmatpush3.bf16.msra.mxu1 %v432_v1 }
 0x12f   :  { %v537_v2 = vpop.f32.mrb[0].mxu0 }
 0x130   :  { %v538_v4 = vpop.f32.mrb[1].mxu0 }
 0x131   :  { %v559_v5 = vpop.f32.mrb[0].mxu1  ;;  %v539_v6 = vadd.f32 %v538_v4, %v537_v2  ;;  %v540_v7 = vpop.f32.mrb[2].mxu0 }
 0x132   :  { %v560_v8 = vpop.f32.mrb[1].mxu1  ;;  %v541_v9 = vpop.f32.mrb[3].mxu0 }
 0x133   :  { %v561_v10 = vadd.f32 %v560_v8, %v559_v5  ;;  %v562_v11 = vpop.f32.mrb[2].mxu1  ;;  %v277_v12 = vadd.f32 %v539_v6, %v509_v3  ;;  %v542_v13 = vadd.f32 %v541_v9, %v540_v7 }
 0x134   :  { %v563_v57 = vpop.f32.mrb[3].mxu1 }
 0x135   :  { %v564_v14 = vadd.f32 %v563_v57, %v562_v11  ;;  %v280_v15 = vadd.f32 %v542_v13, %v509_v3  ;;  %v318_v16 = vadd.f32 %v561_v10, %v277_v12 }
 0x137   :  { %v321_v17 = vadd.f32 %v564_v14, %v280_v15 }
 0x139   :  { %v399_v18 = vpop.f32.mrb[4].mxu1 }
 0x13a   :  { %v602_v19 = vpop.f32.mrb[5].mxu1 }
 0x13b   :  { %v402_v20 = vpop.f32.mrb[6].mxu1 }
 0x13c   :  { %v603_v21 = vpop.f32.mrb[7].mxu1 }
 0x14f   :  { %v581_v22 = vpop.f32.mrb[4].mxu0 }
 0x150   :  { %v582_v23 = vpop.f32.mrb[5].mxu0 }
 0x151   :  { %v583_v24 = vadd.f32 %v582_v23, %v581_v22  ;;  %v584_v25 = vpop.f32.mrb[6].mxu0 }
 0x152   :  { %v585_v26 = vpop.f32.mrb[7].mxu0 }
 0x153   :  { %v359_v27 = vadd.f32 %v583_v24, %v318_v16  ;;  %v586_v28 = vadd.f32 %v585_v26, %v584_v25 }
 0x155   :  { %v400_v29 = vadd.f32 %v399_v18, %v359_v27  ;;  %v362_v30 = vadd.f32 %v586_v28, %v321_v17 }
 0x157   :  { %v403_v31 = vadd.f32 %v402_v20, %v362_v30  ;;  %v406_v32 = vmax.f32 %v400_v29, 0.0 }
 0x159   :  { %v407_v33 = vmax.f32 %v403_v31, 0.0 }
 0x15b   :  { %v408_v34 = vpack.c.bf16 %v407_v33, %v406_v32 }
 0x15d   :  { %621 = vmatmul.mubr.bf16.vlgmr.msra.gmra.mrb[8].mxu1 %v408_v34 }
 0x230   :  { %v474_v36 = vpop.f32.mrb[8].mxu1 }
 0x231   :  { %v622_v37 = vpop.f32.mrb[9].mxu1  ;;  %v475_v39 = vadd.f32 %v511_v35, %v474_v36 }
 0x232   :  { %v477_v38 = vpop.f32.mrb[10].mxu1 }
 0x233   :  { %v478_v40 = vadd.f32 %v511_v35, %v477_v38  ;;  %v623_v41 = vpop.f32.mrb[11].mxu1 }
 0x235   :  { %v519_v42 = vpack.c.bf16 %v478_v40, %v475_v39 }
 0x237   :  { %520 = vst [vmem:[#allocation8] sm:$0xff] %v519_v42  }
 0x238   :  { %495 = vsyncadd [#allocation4], 64  ;;  %s739_s9 = smov [#allocation8]  }
 0x239   :  { %s496_s10 = sshll.u32 %s739_s9, 4  ;;  %s497_s10 = int_to_ptr.vmem [resolvable:$true] %s496_s10 }
 0x23a   :  { %s702_s11 = scalar_lea.vmem %s497_s10, 64  ;;  %s706_s12 = scalar_lea.vmem %s497_s10, 128 }
 0x23b   :  { %p703_p10 = scmp.ne.s32.totalorder %s497_s10, %s702_s11  ;;  %p707_p11 = scmp.lt.s32.totalorder %s497_s10, %s497_s10 }
 0x23c   :  { %p708_p12 = scmp.lt.s32.totalorder %s706_s12, %s702_s11 }
 0x23e   :  { %p709_p13 = por %p708_p12, %p707_p11 }
 0x240   :  { %p710_p0 = pnand %p709_p13, %p703_p10 }
 0x242   :  { %713 = shalt.err (!%p710_p0)
}
 0x243   :  { %s714_s14 = scalar_lea.hbm %s850_s5, 64 }
 0x244   :  { %p715_p1 = scmp.ne.s32.totalorder %s850_s5, %s714_s14  ;;  %p718_p2 = scmp.lt.u32.totalorder %s714_s14, %s850_s5 }
 0x246   :  { %p720_p3 = pnand %p718_p2, %p715_p1 }
 0x248   :  { %723 = shalt.err (!%p720_p3)
}
 0x249   :  { %s740_s18 = smov 64   ;;  %s741_s19 = smov 4  }
 0x24a   :  { %502 = dma.vmem_to_hbm [thread:$0]  %s497_s10, 64, %s850_s5, [#allocation4], %s740_s18, %s740_s18, %s741_s19  }
 0x24b   :  { %728 = dma.done.wait [#allocation4], 128  }
 0x24c   :  { %729 = vsyncadd [#allocation4], 4294967168 }
 0x24d   :  { %506 = vsyncpa [#allocation3], 1 }
 0x24e   :  { %507 = vsyncpa [#allocation6], 1 }
 0x24f   :  { %508 = vsyncpa [#allocation4], 1 }

</bundles_post_ra>
